<compile_context>
chip_gen: v7x
topology: tpu7x:2x2x1
jax: 0.10.0
libtpu: 0.0.40
codegen_flags: <defaults>
</compile_context>

<pallas_src>
import functools

import jax
import jax.numpy as jnp
from jax import lax
from jax.experimental import pallas as pl
from jax.experimental.pallas import tpu as pltpu

LN_EPS = 1e-5
SQRT2 = 1.4142135623730951

_SINGLE_BUFFER_OK = None   # lazily probed: does this build accept pl.Buffered(1)?


def _round_up(x, m):
    return ((x + m - 1) // m) * m


def _gelu_exact(x):
    # PyTorch nn.GELU() default is the exact (erf) formulation.
    return 0.5 * x * (1.0 + lax.erf(x / SQRT2))


def _physical_vmem_bytes():
    try:
        return int(pltpu.get_tpu_info().vmem_capacity_bytes)
    except Exception:
        return 64 * 2**20      # conservative: v7x per-TensorCore VMEM


def _mapping_kernel(x_ref, w1_ref, b1_ref, w2_ref, b2_ref, g_ref, beta_ref, o_ref):
    # x arrives in its original dtype; the bf16 cast for the MXU happens here
    # (free VPU slot under the matmul) instead of as a wrapper-side HBM pass.
    x = x_ref[...].astype(jnp.bfloat16)                                   # [tm, D]
    h = jnp.dot(x, w1_ref[...], preferred_element_type=jnp.float32)       # [tm, d_ff] f32
    h = _gelu_exact(h + b1_ref[...])
    # TODO(synk): dropout is identity (eval mode); training-mode dropout not implemented.
    y = jnp.dot(h.astype(w2_ref.dtype), w2_ref[...],
                preferred_element_type=jnp.float32) + b2_ref[...]         # [tm, D] f32
    # Fused single-pass LayerNorm statistics: mean and E[y^2] in one traversal.
    mean = jnp.mean(y, axis=-1, keepdims=True)
    mean_sq = jnp.mean(y * y, axis=-1, keepdims=True)
    var = mean_sq - mean * mean
    y_hat = (y - mean) * lax.rsqrt(var + LN_EPS)
    o_ref[...] = (y_hat * g_ref[...] + beta_ref[...]).astype(o_ref.dtype)


def _resident_spec(shape, single_buffer):
    """BlockSpec for an operand whose index_map is constant across the grid."""
    if single_buffer:
        # Constant block index -> second pipeline buffer is pure waste; ask for 1.
        return pl.BlockSpec(shape, lambda i: (0, 0), pipeline_mode=pl.Buffered(1))
    return pl.BlockSpec(shape, lambda i: (0, 0))


@functools.partial(jax.jit, static_argnames=("tm", "single_buffer_weights"))
def _forward_impl(x, w_a, b_a, w_b, b_b, gamma, beta, *, tm, single_buffer_weights):
    M, D = x.shape
    d_ff = w_a.shape[1]

    # Weights go to the MXU in bf16 (cast once; they are resident across the
    # whole grid, so bf16 also halves their DMA).  Biases / LN params stay f32.
    w_a_b = w_a.astype(jnp.bfloat16)
    w_b_b = w_b.astype(jnp.bfloat16)
    b_a_f = b_a.astype(jnp.float32)
    b_b_f = b_b.astype(jnp.float32)
    g_f = gamma.astype(jnp.float32)
    beta_f = beta.astype(jnp.float32)

    grid = (pl.cdiv(M, tm),)   # ragged last tile handled by masked loads/stores

    # Scoped-VMEM budget from the actual footprint (2x headroom), clamped to
    # physical VMEM minus headroom so we never ask v7x for more than it has.
    wbuf = 1 if single_buffer_weights else 2
    vmem_est = (
        wbuf * 2 * (D * d_ff + d_ff * D)          # bf16 weight mats
        + 2 * tm * D * x.dtype.itemsize           # x tiles (double-buffered)
        + 2 * tm * D * x.dtype.itemsize           # out tiles (double-buffered)
        + 4 * tm * max(D, d_ff) * 4               # live f32 intermediates (h, y, LN temps)
        + wbuf * (d_ff + 3 * D) * 4               # biases / gamma / beta
    )
    vmem_limit = int(max(16 * 2**20,
                         min(_physical_vmem_bytes() - 8 * 2**20,
                             max(32 * 2**20, 2 * vmem_est))))

    cost = pl.CostEstimate(
        flops=2 * M * D * d_ff * 2,                       # two matmuls
        transcendentals=M * d_ff + 2 * M,                 # erf + rsqrt
        bytes_accessed=(M * D * x.dtype.itemsize          # x
                        + 2 * D * d_ff * 2                # weights (bf16)
                        + (d_ff + 3 * D) * 4              # biases / LN params
                        + M * D * x.dtype.itemsize),      # output
    )

    return pl.pallas_call(
        _mapping_kernel,
        out_shape=jax.ShapeDtypeStruct((M, D), x.dtype),
        grid_spec=pltpu.PrefetchScalarGridSpec(
            num_scalar_prefetch=0,
            grid=grid,
            in_specs=[
                pl.BlockSpec((tm, D), lambda i: (i, 0)),               # x tile
                _resident_spec((D, d_ff), single_buffer_weights),      # W_a (resident)
                _resident_spec((1, d_ff), single_buffer_weights),      # b_a
                _resident_spec((d_ff, D), single_buffer_weights),      # W_b (resident)
                _resident_spec((1, D), single_buffer_weights),         # b_b
                _resident_spec((1, D), single_buffer_weights),         # LN gamma
                _resident_spec((1, D), single_buffer_weights),         # LN beta
            ],
            out_specs=pl.BlockSpec((tm, D), lambda i: (i, 0)),
        ),
        compiler_params=pltpu.CompilerParams(
            dimension_semantics=("parallel",),
            vmem_limit_bytes=vmem_limit,
        ),
        cost_estimate=cost,
    )(x, w_a_b, b_a_f, w_b_b, b_b_f, g_f, beta_f)


def _choose_tm(M, tm_req):
    """MXU-aligned row tile: clamp to the problem (tiny demos -> one grid step)
    and force >= 2 grid steps for large M so v7x's two TensorCores both get rows."""
    tm = max(16, min(int(tm_req), _round_up(M, 16)))
    tm = _round_up(tm, 16)
    if M >= 256 and pl.cdiv(M, tm) < 2:
        tm = _round_up(pl.cdiv(M, 2), 16)
    return tm


def mapping_network_forward(x, w_a, b_a, w_b, b_b, gamma, beta, *, tm=256):
    """x: [M, D]; w_a: [D, d_ff]; b_a: [1, d_ff]; w_b: [d_ff, D]; b_b: [1, D];
    gamma/beta: [1, D].  Returns [M, D] in x.dtype.  `tm` is sweepable
    (128/256/512): bias toward 128-256 on v7x with large D, 256-512 on v5e/v6e
    with large M."""
    global _SINGLE_BUFFER_OK
    M, _ = x.shape
    tm = _choose_tm(M, tm)
    args = (x, w_a, b_a, w_b, b_b, gamma, beta)
    if _SINGLE_BUFFER_OK is None:
        try:
            out = _forward_impl(*args, tm=tm, single_buffer_weights=True)
            jax.block_until_ready(out)
            _SINGLE_BUFFER_OK = True
            return out
        except Exception:
            # This JAX/Mosaic build rejects pl.Buffered(1) on the top-level
            # pipeline -> fall back to default double-buffered resident weights.
            _SINGLE_BUFFER_OK = False
    return _forward_impl(*args, tm=tm, single_buffer_weights=_SINGLE_BUFFER_OK)


def my_mapping_network(x, params, Multiple_i, Multivariate=None):
    """x: [B, S, D] or [M, D]. Branch selection + reshapes are plain-JAX glue.
    Multiple_i must be a static Python int (as in the torch forward)."""
    orig_shape = x.shape
    D = orig_shape[-1]
    x2d = x.reshape(-1, D)
    if Multiple_i == 0:
        w_a, b_a, w_b, b_b = (params["fc1_w"], params["fc1_b"],
                              params["fc2_w"], params["fc2_b"])
    elif Multiple_i == 1:
        w_a, b_a, w_b, b_b = (params["fc3_w"], params["fc3_b"],
                              params["fc4_w"], params["fc4_b"])
    else:
        # Torch forward falls through both branches -> just norm1(x). Tiny rare
        # path handled in plain JAX (no kernel needed).
        mu = x2d.mean(-1, keepdims=True)
        var = ((x2d - mu) ** 2).mean(-1, keepdims=True)
        out = ((x2d - mu) / jnp.sqrt(var + LN_EPS)) * params["ln_gamma"] + params["ln_beta"]
        return out.reshape(orig_shape).astype(x.dtype)
    out = mapping_network_forward(x2d, w_a, b_a, w_b, b_b,
                                  params["ln_gamma"], params["ln_beta"])
    return out.reshape(orig_shape)


def init_params(key, input_dim):
    """Deterministic synthetic init matching nn.Linear / nn.LayerNorm shapes.
    Linear weights are stored pre-transposed: [in, out]."""
    d_ff = input_dim // 2
    ks = jax.random.split(key, 8)

    def lin(kw, kb, fan_in, fan_out):
        bound = 1.0 / jnp.sqrt(fan_in)
        w = jax.random.uniform(kw, (fan_in, fan_out), jnp.float32, -bound, bound)
        b = jax.random.uniform(kb, (1, fan_out), jnp.float32, -bound, bound)
        return w, b

    fc1_w, fc1_b = lin(ks[0], ks[1], input_dim, d_ff)
    fc2_w, fc2_b = lin(ks[2], ks[3], d_ff, input_dim)
    fc3_w, fc3_b = lin(ks[4], ks[5], input_dim, d_ff)
    fc4_w, fc4_b = lin(ks[6], ks[7], d_ff, input_dim)
    return dict(
        fc1_w=fc1_w, fc1_b=fc1_b, fc2_w=fc2_w, fc2_b=fc2_b,
        fc3_w=fc3_w, fc3_b=fc3_b, fc4_w=fc4_w, fc4_b=fc4_b,
        ln_gamma=jnp.ones((1, input_dim), jnp.float32),
        ln_beta=jnp.zeros((1, input_dim), jnp.float32),
    )


def _reference(x, params, Multiple_i, match_precision=True):
    """Pure-JAX reference. match_precision=True mirrors the kernel's bf16 MXU
    inputs / f32 accumulation; False is the pure-f32 torch-equivalent math."""
    D = x.shape[-1]
    x2d = x.reshape(-1, D)
    if Multiple_i == 0:
        w_a, b_a, w_b, b_b = (params["fc1_w"], params["fc1_b"],
                              params["fc2_w"], params["fc2_b"])
    else:
        w_a, b_a, w_b, b_b = (params["fc3_w"], params["fc3_b"],
                              params["fc4_w"], params["fc4_b"])
    cd = jnp.bfloat16 if match_precision else jnp.float32
    h = jnp.dot(x2d.astype(cd), w_a.astype(cd),
                preferred_element_type=jnp.float32) + b_a
    h = jax.nn.gelu(h, approximate=False)
    y = jnp.dot(h.astype(cd), w_b.astype(cd),
                preferred_element_type=jnp.float32) + b_b
    mu = y.mean(-1, keepdims=True)
    var = ((y - mu) ** 2).mean(-1, keepdims=True)
    out = (y - mu) / jnp.sqrt(var + LN_EPS) * params["ln_gamma"] + params["ln_beta"]
    return out.reshape(x.shape)


if __name__ == "__main__":
    batch, seq, input_dim = 2, 8, 32          # M = 16 rows, D = 32, d_ff = 16
    key = jax.random.PRNGKey(0)
    k_x, k_p = jax.random.split(key)
    x = jax.random.normal(k_x, (batch, seq, input_dim), jnp.float32)
    params = init_params(k_p, input_dim)

    out0 = my_mapping_network(x, params, Multiple_i=0, Multivariate=None)
    out1 = my_mapping_network(x, params, Multiple_i=1, Multivariate=None)
    jax.block_until_ready(out0)
    jax.block_until_ready(out1)

    # Matched-precision reference (bf16 MXU inputs, f32 accumulation) — tight.
    ref0_m = _reference(x, params, 0, match_precision=True)
    ref1_m = _reference(x, params, 1, match_precision=True)
    # Full-f32 reference (torch semantics) — loose tolerance for bf16 matmuls.
    ref0_f = _reference(x, params, 0, match_precision=False)
    ref1_f = _reference(x, params, 1, match_precision=False)

    assert out0.shape == x.shape and out1.shape == x.shape
    assert jnp.allclose(out0, ref0_m, atol=3e-3, rtol=3e-3)
    assert jnp.allclose(out1, ref1_m, atol=3e-3, rtol=3e-3)
    assert jnp.allclose(out0, ref0_f, atol=7e-2, rtol=7e-2)
    assert jnp.allclose(out1, ref1_f, atol=7e-2, rtol=7e-2)

    print("KERNEL_OK")
</pallas_src>

<mosaic_0001>
module attributes {stable_mosaic.version = 11 : i64} {
  func.func @_mapping_kernel(%arg0: i32, %arg1: memref<16x32xf32, #tpu.memory_space<vmem>>, %arg2: memref<32x16xbf16, #tpu.memory_space<vmem>>, %arg3: memref<1x16xf32, #tpu.memory_space<vmem>>, %arg4: memref<16x32xbf16, #tpu.memory_space<vmem>>, %arg5: memref<1x32xf32, #tpu.memory_space<vmem>>, %arg6: memref<1x32xf32, #tpu.memory_space<vmem>>, %arg7: memref<1x32xf32, #tpu.memory_space<vmem>>, %arg8: memref<16x32xf32, #tpu.memory_space<vmem>>) attributes {dimension_semantics = [#tpu.dimension_semantics<parallel>], iteration_bounds = array<i64: 1>, scalar_prefetch = 0 : i64, scratch_operands = 0 : i64, tpu.core_type = #tpu.core_type<tc>, window_params = [{transform_indices = @transform_0, window_bounds = array<i64: 16, 32>}, {pipeline_mode = #tpu.pipeline_mode<synchronous>, transform_indices = @transform_1, window_bounds = array<i64: 32, 16>}, {pipeline_mode = #tpu.pipeline_mode<synchronous>, transform_indices = @transform_2, window_bounds = array<i64: 1, 16>}, {pipeline_mode = #tpu.pipeline_mode<synchronous>, transform_indices = @transform_3, window_bounds = array<i64: 16, 32>}, {pipeline_mode = #tpu.pipeline_mode<synchronous>, transform_indices = @transform_4, window_bounds = array<i64: 1, 32>}, {pipeline_mode = #tpu.pipeline_mode<synchronous>, transform_indices = @transform_5, window_bounds = array<i64: 1, 32>}, {pipeline_mode = #tpu.pipeline_mode<synchronous>, transform_indices = @transform_6, window_bounds = array<i64: 1, 32>}, {transform_indices = @transform_7, window_bounds = array<i64: 16, 32>}]} {
    %c0 = arith.constant 0 : index
    %c0_0 = arith.constant 0 : index
    %0 = vector.load %arg1[%c0, %c0_0] : memref<16x32xf32, #tpu.memory_space<vmem>>, vector<16x32xf32>
    %1 = arith.truncf %0 : vector<16x32xf32> to vector<16x32xbf16>
    %c0_1 = arith.constant 0 : index
    %c0_2 = arith.constant 0 : index
    %2 = vector.load %arg2[%c0_1, %c0_2] : memref<32x16xbf16, #tpu.memory_space<vmem>>, vector<32x16xbf16>
    %cst = arith.constant dense<0.000000e+00> : vector<16x16xf32>
    %3 = tpu.matmul %1, %2, %cst {dimension_numbers = #tpu.dot_dimension_numbers<[1], [0], [0], [1], [0, 0, 1, 1], [], []>} : vector<16x32xbf16>, vector<32x16xbf16>, vector<16x16xf32> -> vector<16x16xf32>
    %c0_3 = arith.constant 0 : index
    %c0_4 = arith.constant 0 : index
    %4 = vector.load %arg3[%c0_3, %c0_4] : memref<1x16xf32, #tpu.memory_space<vmem>>, vector<1x16xf32>
    %5 = vector.broadcast %4 : vector<1x16xf32> to vector<16x16xf32>
    %6 = arith.addf %3, %5 : vector<16x16xf32>
    %cst_5 = arith.constant 5.000000e-01 : f32
    %7 = vector.broadcast %cst_5 : f32 to vector<16x16xf32>
    %8 = arith.mulf %7, %6 : vector<16x16xf32>
    %cst_6 = arith.constant 1.41421354 : f32
    %9 = vector.broadcast %cst_6 : f32 to vector<16x16xf32>
    %10 = arith.divf %6, %9 : vector<16x16xf32>
    %11 = math.erf %10 : vector<16x16xf32>
    %cst_7 = arith.constant 1.000000e+00 : f32
    %12 = vector.broadcast %cst_7 : f32 to vector<16x16xf32>
    %13 = arith.addf %12, %11 : vector<16x16xf32>
    %14 = arith.mulf %8, %13 : vector<16x16xf32>
    %15 = arith.truncf %14 : vector<16x16xf32> to vector<16x16xbf16>
    %c0_8 = arith.constant 0 : index
    %c0_9 = arith.constant 0 : index
    %16 = vector.load %arg4[%c0_8, %c0_9] : memref<16x32xbf16, #tpu.memory_space<vmem>>, vector<16x32xbf16>
    %cst_10 = arith.constant dense<0.000000e+00> : vector<16x32xf32>
    %17 = tpu.matmul %15, %16, %cst_10 {dimension_numbers = #tpu.dot_dimension_numbers<[1], [0], [0], [1], [0, 0, 1, 1], [], []>} : vector<16x16xbf16>, vector<16x32xbf16>, vector<16x32xf32> -> vector<16x32xf32>
    %c0_11 = arith.constant 0 : index
    %c0_12 = arith.constant 0 : index
    %18 = vector.load %arg5[%c0_11, %c0_12] : memref<1x32xf32, #tpu.memory_space<vmem>>, vector<1x32xf32>
    %19 = vector.broadcast %18 : vector<1x32xf32> to vector<16x32xf32>
    %20 = arith.addf %17, %19 : vector<16x32xf32>
    %cst_13 = arith.constant dense<0.000000e+00> : vector<16xf32>
    %21 = vector.multi_reduction <add>, %20, %cst_13 [1] : vector<16x32xf32> to vector<16xf32>
    %22 = vector.shape_cast %21 : vector<16xf32> to vector<16x1xf32>
    %cst_14 = arith.constant 3.200000e+01 : f32
    %23 = vector.broadcast %cst_14 : f32 to vector<16x1xf32>
    %24 = arith.divf %22, %23 : vector<16x1xf32>
    %25 = arith.mulf %20, %20 : vector<16x32xf32>
    %cst_15 = arith.constant dense<0.000000e+00> : vector<16xf32>
    %26 = vector.multi_reduction <add>, %25, %cst_15 [1] : vector<16x32xf32> to vector<16xf32>
    %27 = vector.shape_cast %26 : vector<16xf32> to vector<16x1xf32>
    %cst_16 = arith.constant 3.200000e+01 : f32
    %28 = vector.broadcast %cst_16 : f32 to vector<16x1xf32>
    %29 = arith.divf %27, %28 : vector<16x1xf32>
    %30 = arith.mulf %24, %24 : vector<16x1xf32>
    %31 = arith.subf %29, %30 : vector<16x1xf32>
    %32 = vector.broadcast %24 : vector<16x1xf32> to vector<16x32xf32>
    %33 = arith.subf %20, %32 : vector<16x32xf32>
    %cst_17 = arith.constant 9.99999974E-6 : f32
    %34 = vector.broadcast %cst_17 : f32 to vector<16x1xf32>
    %35 = arith.addf %31, %34 : vector<16x1xf32>
    %36 = math.rsqrt %35 : vector<16x1xf32>
    %37 = vector.broadcast %36 : vector<16x1xf32> to vector<16x32xf32>
    %38 = arith.mulf %33, %37 : vector<16x32xf32>
    %c0_18 = arith.constant 0 : index
    %c0_19 = arith.constant 0 : index
    %39 = vector.load %arg6[%c0_18, %c0_19] : memref<1x32xf32, #tpu.memory_space<vmem>>, vector<1x32xf32>
    %40 = vector.broadcast %39 : vector<1x32xf32> to vector<16x32xf32>
    %41 = arith.mulf %38, %40 : vector<16x32xf32>
    %c0_20 = arith.constant 0 : index
    %c0_21 = arith.constant 0 : index
    %42 = vector.load %arg7[%c0_20, %c0_21] : memref<1x32xf32, #tpu.memory_space<vmem>>, vector<1x32xf32>
    %43 = vector.broadcast %42 : vector<1x32xf32> to vector<16x32xf32>
    %44 = arith.addf %41, %43 : vector<16x32xf32>
    %c0_22 = arith.constant 0 : index
    %c0_23 = arith.constant 0 : index
    %45 = vector.load %arg8[%c0_22, %c0_23] : memref<16x32xf32, #tpu.memory_space<vmem>>, vector<16x32xf32>
    tpu.vector_store %arg8[%c0_22, %c0_23], %44 {strides = array<i32>} : memref<16x32xf32, #tpu.memory_space<vmem>>, vector<16x32xf32>,
    return
  }
  func.func @transform_0(%arg0: i32) -> (i32, i32) {
    %c0_i32 = arith.constant 0 : i32
    %c0_i32_0 = arith.constant 0 : i32
    return %arg0, %c0_i32 : i32, i32
  }
  func.func @transform_1(%arg0: i32) -> (i32, i32) {
    %c0_i32 = arith.constant 0 : i32
    %c0_i32_0 = arith.constant 0 : i32
    %c0_i32_1 = arith.constant 0 : i32
    return %c0_i32, %c0_i32_0 : i32, i32
  }
  func.func @transform_2(%arg0: i32) -> (i32, i32) {
    %c0_i32 = arith.constant 0 : i32
    %c0_i32_0 = arith.constant 0 : i32
    %c0_i32_1 = arith.constant 0 : i32
    return %c0_i32, %c0_i32_0 : i32, i32
  }
  func.func @transform_3(%arg0: i32) -> (i32, i32) {
    %c0_i32 = arith.constant 0 : i32
    %c0_i32_0 = arith.constant 0 : i32
    %c0_i32_1 = arith.constant 0 : i32
    return %c0_i32, %c0_i32_0 : i32, i32
  }
  func.func @transform_4(%arg0: i32) -> (i32, i32) {
    %c0_i32 = arith.constant 0 : i32
    %c0_i32_0 = arith.constant 0 : i32
    %c0_i32_1 = arith.constant 0 : i32
    return %c0_i32, %c0_i32_0 : i32, i32
  }
  func.func @transform_5(%arg0: i32) -> (i32, i32) {
    %c0_i32 = arith.constant 0 : i32
    %c0_i32_0 = arith.constant 0 : i32
    %c0_i32_1 = arith.constant 0 : i32
    return %c0_i32, %c0_i32_0 : i32, i32
  }
  func.func @transform_6(%arg0: i32) -> (i32, i32) {
    %c0_i32 = arith.constant 0 : i32
    %c0_i32_0 = arith.constant 0 : i32
    %c0_i32_1 = arith.constant 0 : i32
    return %c0_i32, %c0_i32_0 : i32, i32
  }
  func.func @transform_7(%arg0: i32) -> (i32, i32) {
    %c0_i32 = arith.constant 0 : i32
    %c0_i32_0 = arith.constant 0 : i32
    return %arg0, %c0_i32 : i32, i32
  }
}

module attributes {stable_mosaic.version = 11 : i64} {
  func.func @_mapping_kernel(%arg0: i32, %arg1: memref<16x32xf32, #tpu.memory_space<vmem>>, %arg2: memref<32x16xbf16, #tpu.memory_space<vmem>>, %arg3: memref<1x16xf32, #tpu.memory_space<vmem>>, %arg4: memref<16x32xbf16, #tpu.memory_space<vmem>>, %arg5: memref<1x32xf32, #tpu.memory_space<vmem>>, %arg6: memref<1x32xf32, #tpu.memory_space<vmem>>, %arg7: memref<1x32xf32, #tpu.memory_space<vmem>>, %arg8: memref<16x32xf32, #tpu.memory_space<vmem>>) attributes {dimension_semantics = [#tpu.dimension_semantics<parallel>], iteration_bounds = array<i64: 1>, scalar_prefetch = 0 : i64, scratch_operands = 0 : i64, tpu.core_type = #tpu.core_type<tc>, window_params = [{transform_indices = @transform_0, window_bounds = array<i64: 16, 32>}, {pipeline_mode = #tpu.pipeline_mode<synchronous>, transform_indices = @transform_1, window_bounds = array<i64: 32, 16>}, {pipeline_mode = #tpu.pipeline_mode<synchronous>, transform_indices = @transform_2, window_bounds = array<i64: 1, 16>}, {pipeline_mode = #tpu.pipeline_mode<synchronous>, transform_indices = @transform_3, window_bounds = array<i64: 16, 32>}, {pipeline_mode = #tpu.pipeline_mode<synchronous>, transform_indices = @transform_4, window_bounds = array<i64: 1, 32>}, {pipeline_mode = #tpu.pipeline_mode<synchronous>, transform_indices = @transform_5, window_bounds = array<i64: 1, 32>}, {pipeline_mode = #tpu.pipeline_mode<synchronous>, transform_indices = @transform_6, window_bounds = array<i64: 1, 32>}, {transform_indices = @transform_7, window_bounds = array<i64: 16, 32>}]} {
    %c0 = arith.constant 0 : index
    %c0_0 = arith.constant 0 : index
    %0 = vector.load %arg1[%c0, %c0_0] : memref<16x32xf32, #tpu.memory_space<vmem>>, vector<16x32xf32>
    %1 = arith.truncf %0 : vector<16x32xf32> to vector<16x32xbf16>
    %c0_1 = arith.constant 0 : index
    %c0_2 = arith.constant 0 : index
    %2 = vector.load %arg2[%c0_1, %c0_2] : memref<32x16xbf16, #tpu.memory_space<vmem>>, vector<32x16xbf16>
    %cst = arith.constant dense<0.000000e+00> : vector<16x16xf32>
    %3 = tpu.matmul %1, %2, %cst {dimension_numbers = #tpu.dot_dimension_numbers<[1], [0], [0], [1], [0, 0, 1, 1], [], []>} : vector<16x32xbf16>, vector<32x16xbf16>, vector<16x16xf32> -> vector<16x16xf32>
    %c0_3 = arith.constant 0 : index
    %c0_4 = arith.constant 0 : index
    %4 = vector.load %arg3[%c0_3, %c0_4] : memref<1x16xf32, #tpu.memory_space<vmem>>, vector<1x16xf32>
    %5 = vector.broadcast %4 : vector<1x16xf32> to vector<16x16xf32>
    %6 = arith.addf %3, %5 : vector<16x16xf32>
    %cst_5 = arith.constant 5.000000e-01 : f32
    %7 = vector.broadcast %cst_5 : f32 to vector<16x16xf32>
    %8 = arith.mulf %7, %6 : vector<16x16xf32>
    %cst_6 = arith.constant 1.41421354 : f32
    %9 = vector.broadcast %cst_6 : f32 to vector<16x16xf32>
    %10 = arith.divf %6, %9 : vector<16x16xf32>
    %11 = math.erf %10 : vector<16x16xf32>
    %cst_7 = arith.constant 1.000000e+00 : f32
    %12 = vector.broadcast %cst_7 : f32 to vector<16x16xf32>
    %13 = arith.addf %12, %11 : vector<16x16xf32>
    %14 = arith.mulf %8, %13 : vector<16x16xf32>
    %15 = arith.truncf %14 : vector<16x16xf32> to vector<16x16xbf16>
    %c0_8 = arith.constant 0 : index
    %c0_9 = arith.constant 0 : index
    %16 = vector.load %arg4[%c0_8, %c0_9] : memref<16x32xbf16, #tpu.memory_space<vmem>>, vector<16x32xbf16>
    %cst_10 = arith.constant dense<0.000000e+00> : vector<16x32xf32>
    %17 = tpu.matmul %15, %16, %cst_10 {dimension_numbers = #tpu.dot_dimension_numbers<[1], [0], [0], [1], [0, 0, 1, 1], [], []>} : vector<16x16xbf16>, vector<16x32xbf16>, vector<16x32xf32> -> vector<16x32xf32>
    %c0_11 = arith.constant 0 : index
    %c0_12 = arith.constant 0 : index
    %18 = vector.load %arg5[%c0_11, %c0_12] : memref<1x32xf32, #tpu.memory_space<vmem>>, vector<1x32xf32>
    %19 = vector.broadcast %18 : vector<1x32xf32> to vector<16x32xf32>
    %20 = arith.addf %17, %19 : vector<16x32xf32>
    %cst_13 = arith.constant dense<0.000000e+00> : vector<16xf32>
    %21 = vector.multi_reduction <add>, %20, %cst_13 [1] : vector<16x32xf32> to vector<16xf32>
    %22 = vector.shape_cast %21 : vector<16xf32> to vector<16x1xf32>
    %cst_14 = arith.constant 3.200000e+01 : f32
    %23 = vector.broadcast %cst_14 : f32 to vector<16x1xf32>
    %24 = arith.divf %22, %23 : vector<16x1xf32>
    %25 = arith.mulf %20, %20 : vector<16x32xf32>
    %cst_15 = arith.constant dense<0.000000e+00> : vector<16xf32>
    %26 = vector.multi_reduction <add>, %25, %cst_15 [1] : vector<16x32xf32> to vector<16xf32>
    %27 = vector.shape_cast %26 : vector<16xf32> to vector<16x1xf32>
    %cst_16 = arith.constant 3.200000e+01 : f32
    %28 = vector.broadcast %cst_16 : f32 to vector<16x1xf32>
    %29 = arith.divf %27, %28 : vector<16x1xf32>
    %30 = arith.mulf %24, %24 : vector<16x1xf32>
    %31 = arith.subf %29, %30 : vector<16x1xf32>
    %32 = vector.broadcast %24 : vector<16x1xf32> to vector<16x32xf32>
    %33 = arith.subf %20, %32 : vector<16x32xf32>
    %cst_17 = arith.constant 9.99999974E-6 : f32
    %34 = vector.broadcast %cst_17 : f32 to vector<16x1xf32>
    %35 = arith.addf %31, %34 : vector<16x1xf32>
    %36 = math.rsqrt %35 : vector<16x1xf32>
    %37 = vector.broadcast %36 : vector<16x1xf32> to vector<16x32xf32>
    %38 = arith.mulf %33, %37 : vector<16x32xf32>
    %c0_18 = arith.constant 0 : index
    %c0_19 = arith.constant 0 : index
    %39 = vector.load %arg6[%c0_18, %c0_19] : memref<1x32xf32, #tpu.memory_space<vmem>>, vector<1x32xf32>
    %40 = vector.broadcast %39 : vector<1x32xf32> to vector<16x32xf32>
    %41 = arith.mulf %38, %40 : vector<16x32xf32>
    %c0_20 = arith.constant 0 : index
    %c0_21 = arith.constant 0 : index
    %42 = vector.load %arg7[%c0_20, %c0_21] : memref<1x32xf32, #tpu.memory_space<vmem>>, vector<1x32xf32>
    %43 = vector.broadcast %42 : vector<1x32xf32> to vector<16x32xf32>
    %44 = arith.addf %41, %43 : vector<16x32xf32>
    %c0_22 = arith.constant 0 : index
    %c0_23 = arith.constant 0 : index
    %45 = vector.load %arg8[%c0_22, %c0_23] : memref<16x32xf32, #tpu.memory_space<vmem>>, vector<16x32xf32>
    tpu.vector_store %arg8[%c0_22, %c0_23], %44 {strides = array<i32>} : memref<16x32xf32, #tpu.memory_space<vmem>>, vector<16x32xf32>,
    return
  }
  func.func @transform_0(%arg0: i32) -> (i32, i32) {
    %c0_i32 = arith.constant 0 : i32
    %c0_i32_0 = arith.constant 0 : i32
    return %arg0, %c0_i32 : i32, i32
  }
  func.func @transform_1(%arg0: i32) -> (i32, i32) {
    %c0_i32 = arith.constant 0 : i32
    %c0_i32_0 = arith.constant 0 : i32
    %c0_i32_1 = arith.constant 0 : i32
    return %c0_i32, %c0_i32_0 : i32, i32
  }
  func.func @transform_2(%arg0: i32) -> (i32, i32) {
    %c0_i32 = arith.constant 0 : i32
    %c0_i32_0 = arith.constant 0 : i32
    %c0_i32_1 = arith.constant 0 : i32
    return %c0_i32, %c0_i32_0 : i32, i32
  }
  func.func @transform_3(%arg0: i32) -> (i32, i32) {
    %c0_i32 = arith.constant 0 : i32
    %c0_i32_0 = arith.constant 0 : i32
    %c0_i32_1 = arith.constant 0 : i32
    return %c0_i32, %c0_i32_0 : i32, i32
  }
  func.func @transform_4(%arg0: i32) -> (i32, i32) {
    %c0_i32 = arith.constant 0 : i32
    %c0_i32_0 = arith.constant 0 : i32
    %c0_i32_1 = arith.constant 0 : i32
    return %c0_i32, %c0_i32_0 : i32, i32
  }
  func.func @transform_5(%arg0: i32) -> (i32, i32) {
    %c0_i32 = arith.constant 0 : i32
    %c0_i32_0 = arith.constant 0 : i32
    %c0_i32_1 = arith.constant 0 : i32
    return %c0_i32, %c0_i32_0 : i32, i32
  }
  func.func @transform_6(%arg0: i32) -> (i32, i32) {
    %c0_i32 = arith.constant 0 : i32
    %c0_i32_0 = arith.constant 0 : i32
    %c0_i32_1 = arith.constant 0 : i32
    return %c0_i32, %c0_i32_0 : i32, i32
  }
  func.func @transform_7(%arg0: i32) -> (i32, i32) {
    %c0_i32 = arith.constant 0 : i32
    %c0_i32_0 = arith.constant 0 : i32
    return %arg0, %c0_i32 : i32, i32
  }
}

</mosaic_0001>

<bundles_post_ra>
// kernel: _forward_impl.1
= control target key start
LH: loop header
LB: loop body
LE: loop exit
PB: predicated region body
PF: predicated region fallthrough
CT: control target
= control target key end

     0   :  { %v306_v1 = vmov 0.0   ;;  %vm307_vm0 = vmmov 0   ;;  %s397_s0 = inlined_call_operand.vmem [shape: f32[16,32], index: 0, kind: input, shape index: {}]   ;;  %s398_s1 = inlined_call_operand.vmem [shape: bf16[32,16], index: 1, kind: input, shape index: {}]   ;;  %s399_s2 = inlined_call_operand.vmem [shape: f32[1,16], index: 2, kind: input, shape index: {}]   ;;  %s400_s3 = inlined_call_operand.vmem [shape: bf16[16,32], index: 3, kind: input, shape index: {}]   ;;  %s401_s4 = inlined_call_operand.vmem [shape: f32[1,32], index: 4, kind: input, shape index: {}]   ;;  %s402_s5 = inlined_call_operand.vmem [shape: f32[1,32], index: 5, kind: input, shape index: {}]   ;;  %s403_s6 = inlined_call_operand.vmem [shape: f32[1,32], index: 6, kind: input, shape index: {}]   ;;  %s404_s7 = inlined_call_operand.hbm [shape: f32[16,32], index: 7, kind: output, shape index: {}]  }
   0x1   :  { %v271_v0 = vld [vmem:[%s398_s1] sm:$0xff]   ;;  %252 = vmatprep.subr.bf16.mxu0 %v306_v1  ;;  %260 = vmatprep.subr.bf16.mxu1 %v306_v1  ;;  %v272_v2 = vld [vmem:[%s398_s1 + $0x8] sm:$0xff]  }
   0x2   :  { %253 = vmatpush3.bf16.msra.mxu0 %v271_v0  ;;  %256 = vmatprep.mubr.msk.bf16.mxu0 %vm307_vm0, %v306_v1  ;;  %v28_v3 = vld [vmem:[%s397_s0] sm:$0xff]  ;;  %v29_v4 = vld [vmem:[%s397_s0 + $0x8] sm:$0xff] }
   0x3   :  { %254 = vmatprep.subr.bf16.mxu0 %v306_v1  ;;  %262 = vmatprep.mubr.msk.bf16.mxu1 %vm307_vm0, %v306_v1 }
   0x4   :  { %12 = vsyncpa [#allocation3], 0  ;;  %v30_v5 = vpack.c.bf16 %v29_v4, %v28_v3  ;;  %vm54_vm1 = vcmask 261120   ;;  %v273_v6 = vld [vmem:[%s400_s3] sm:$0xff]   ;;  %vm126_vm2 = vcmask 130048   ;;  %s308_s14 = smov [#allocation2]  }
   0x5   :  { %261 = vmatpush3.bf16.msra.mxu1 %v273_v6  ;;  %v238_v7 = vld [vmem:[%s399_s2] ss:$0 sm:$0xff]  ;;  %s227_s15 = sshll.u32 %s308_s14, 4  ;;  %s228_s15 = int_to_ptr.vmem [resolvable:$true] %s227_s15 }
   0x6   :  { %255 = vmatpush3.bf16.msra.mxu0 %v272_v2  ;;  %v242_v25 = vld [vmem:[%s401_s4] ss:$0 sm:$0xff]  ;;  %p287_p1 = scmp.lt.s32.totalorder %s228_s15, %s228_s15 }
   0x7   :  { %v245_v54 = vld [vmem:[%s402_s5] ss:$0 sm:$0xff]  ;;  %s282_s5 = scalar_lea.vmem %s228_s15, 256 }
   0x8   :  { %v246_v56 = vld [vmem:[%s403_s6] ss:$0 sm:$0xff]  ;;  %p283_p0 = scmp.ne.s32.totalorder %s228_s15, %s282_s5  ;;  %p288_p2 = scmp.lt.s32.totalorder %s282_s5, %s282_s5 }
   0x9   :  { %257 = vmatmul.mubr.msk.bf16.vlgmr.msra.gmra.mrb[0].mxu0 %vm54_vm1, %v30_v5 }
   0xa   :  { %p289_p3 = por %p288_p2, %p287_p1 }
   0xc   :  { %p290_p4 = pnand %p289_p3, %p283_p0 }
  0xdc   :  { %v92_v8 = vpop.f32.mrb[0].mxu0 }
  0xdd   :  { %v93_v9 = vadd.f32 %v238_v7, %v92_v8  ;;  %v258_v10 = vpop.f32.mrb[1].mxu0 }
  0xde   :  { %v95_v11 = vpop.f32.mrb[2].mxu0 }
  0xdf   :  { %v102_v12 = vmul.f32 0.70710677, %v93_v9  ;;  %v96_v13 = vadd.f32 %v238_v7, %v95_v11  ;;  %v259_v14 = vpop.f32.mrb[3].mxu0  ;;  %v99_v19 = vmul.f32 0.5, %v93_v9 }
  0xe1   :  { %274 = verf.f32 %v102_v12  ;;  %v103_v15 = vmul.f32 0.70710677, %v96_v13  ;;  %v100_v20 = vmul.f32 0.5, %v96_v13 }
  0xe3   :  { %276 = verf.f32 %v103_v15 }
  0xeb   :  { %v275_v16 = vpop.eup %274 }
  0xec   :  { %v106_v17 = vadd.f32 1.0, %v275_v16 }
  0xed   :  { %v277_v18 = vpop.eup %276 }
  0xee   :  { %v107_v21 = vadd.f32 1.0, %v277_v18  ;;  %v108_v22 = vmul.f32 %v106_v17, %v99_v19 }
  0xf0   :  { %v109_v23 = vmul.f32 %v107_v21, %v100_v20 }
  0xf2   :  { %v110_v24 = vpack.c.bf16 %v109_v23, %v108_v22 }
  0xf4   :  { %263 = vmatmul.mubr.msk.bf16.vlgmr.msra.gmra.mrb[0].mxu1 %vm126_vm2, %v110_v24 }
 0x1c7   :  { %v164_v26 = vpop.f32.mrb[0].mxu1 }
 0x1c8   :  { %v165_v27 = vadd.f32 %v242_v25, %v164_v26  ;;  %v264_v28 = vpop.f32.mrb[1].mxu1 }
 0x1c9   :  { %v167_v29 = vpop.f32.mrb[2].mxu1 }
 0x1ca   :  { %v168_v30 = vadd.f32 %v242_v25, %v167_v29  ;;  %v265_v31 = vpop.f32.mrb[3].mxu1  ;;  %v171_v32 = vsel %vm54_vm1, %v165_v27, 0.0  ;;  %v180_v33 = vmul.f32 %v165_v27, %v165_v27 }
 0x1cb   :  { %172 = vadd.xlane.f32.xlu0 %v171_v32 }
 0x1cc   :  { %v182_v34 = vsel %vm54_vm1, %v180_v33, 0.0  ;;  %v181_v35 = vmul.f32 %v168_v30, %v168_v30  ;;  %v174_v36 = vsel %vm54_vm1, %v168_v30, 0.0 }
 0x1cd   :  { %183 = vadd.xlane.f32.xlu1 %v182_v34 }
 0x1ce   :  { %v185_v37 = vsel %vm54_vm1, %v181_v35, 0.0 }
 0x1cf   :  { %175 = vadd.xlane.f32.xlu0 %v174_v36 }
 0x1d1   :  { %186 = vadd.xlane.f32.xlu1 %v185_v37 }
 0x258   :  { %v173_v38 = vpop.xlane.xlu0 %172 }
 0x259   :  { %v178_v39 = vmul.f32 0.03125, %v173_v38 }
 0x25a   :  { %v184_v40 = vpop.xlane.xlu1 %183 }
 0x25b   :  { %v190_v41 = vmul.f32 %v178_v39, %v178_v39  ;;  %v188_v42 = vmul.f32 0.03125, %v184_v40  ;;  %v194_v52 = vsub.f32 %v165_v27, %v178_v39 }
 0x25c   :  { %v176_v43 = vpop.xlane.xlu0 %175 }
 0x25d   :  { %v192_v44 = vsub.f32 %v188_v42, %v190_v41  ;;  %v179_v45 = vmul.f32 0.03125, %v176_v43 }
 0x25e   :  { %v187_v46 = vpop.xlane.xlu1 %186 }
 0x25f   :  { %v196_v47 = vadd.f32 1e-05, %v192_v44  ;;  %v191_v48 = vmul.f32 %v179_v45, %v179_v45  ;;  %v189_v49 = vmul.f32 0.03125, %v187_v46  ;;  %v195_v57 = vsub.f32 %v168_v30, %v179_v45 }
 0x261   :  { %278 = vrsqrt.f32 %v196_v47  ;;  %v193_v50 = vsub.f32 %v189_v49, %v191_v48 }
 0x263   :  { %v197_v51 = vadd.f32 1e-05, %v193_v50 }
 0x265   :  { %280 = vrsqrt.f32 %v197_v51 }
 0x26b   :  { %v279_v53 = vpop.eup %278 }
 0x26c   :  { %v200_v55 = vmul.f32 %v279_v53, %v194_v52 }
 0x26e   :  { %v209_v58 = vmul.f32 %v245_v54, %v200_v55 }
 0x26f   :  { %v281_v59 = vpop.eup %280 }
 0x270   :  { %v201_v60 = vmul.f32 %v281_v59, %v195_v57  ;;  %v218_v61 = vadd.f32 %v246_v56, %v209_v58 }
 0x272   :  { %v210_v62 = vmul.f32 %v245_v54, %v201_v60  ;;  %220 = vst.msk [vmem:[#allocation2] sm:$0xff] %vm54_vm1, %v218_v61 }
 0x274   :  { %v219_v63 = vadd.f32 %v246_v56, %v210_v62 }
 0x276   :  { %221 = vst.msk [vmem:[#allocation2 + $0x8] sm:$0xff] %vm54_vm1, %v219_v63 }
 0x277   :  { %293 = shalt.err (!%p290_p4)
}
 0x278   :  { %s294_s17 = scalar_lea.hbm %s404_s7, 256 }
 0x279   :  { %p295_p5 = scmp.ne.s32.totalorder %s404_s7, %s294_s17  ;;  %p298_p6 = scmp.lt.u32.totalorder %s294_s17, %s404_s7 }
 0x27b   :  { %p300_p7 = pnand %p298_p6, %p295_p5 }
 0x27d   :  { %303 = shalt.err (!%p300_p7)
}
 0x27e   :  { %s309_s22 = smov 128   ;;  %s310_s23 = smov 8  }
 0x27f   :  { %233 = dma.vmem_to_hbm [thread:$0]  %s228_s15, 256, %s404_s7, [#allocation3], %s309_s22, %s309_s22, %s310_s23  }
 0x280   :  { %304 = dma.done.wait [#allocation3], 256  }
 0x281   :  { %305 = vsyncadd [#allocation3], 4294967040 }
 0x282   :  { %237 = vsyncpa [#allocation3], 1 }

// kernel: _forward_impl.1
= control target key start
LH: loop header
LB: loop body
LE: loop exit
PB: predicated region body
PF: predicated region fallthrough
CT: control target
= control target key end

     0   :  { %v306_v1 = vmov 0.0   ;;  %vm307_vm0 = vmmov 0   ;;  %s397_s0 = inlined_call_operand.vmem [shape: f32[16,32], index: 0, kind: input, shape index: {}]   ;;  %s398_s1 = inlined_call_operand.vmem [shape: bf16[32,16], index: 1, kind: input, shape index: {}]   ;;  %s399_s2 = inlined_call_operand.vmem [shape: f32[1,16], index: 2, kind: input, shape index: {}]   ;;  %s400_s3 = inlined_call_operand.vmem [shape: bf16[16,32], index: 3, kind: input, shape index: {}]   ;;  %s401_s4 = inlined_call_operand.vmem [shape: f32[1,32], index: 4, kind: input, shape index: {}]   ;;  %s402_s5 = inlined_call_operand.vmem [shape: f32[1,32], index: 5, kind: input, shape index: {}]   ;;  %s403_s6 = inlined_call_operand.vmem [shape: f32[1,32], index: 6, kind: input, shape index: {}]   ;;  %s404_s7 = inlined_call_operand.hbm [shape: f32[16,32], index: 7, kind: output, shape index: {}]  }
   0x1   :  { %v271_v0 = vld [vmem:[%s398_s1] sm:$0xff]   ;;  %252 = vmatprep.subr.bf16.mxu0 %v306_v1  ;;  %260 = vmatprep.subr.bf16.mxu1 %v306_v1  ;;  %v272_v2 = vld [vmem:[%s398_s1 + $0x8] sm:$0xff]  }
   0x2   :  { %253 = vmatpush3.bf16.msra.mxu0 %v271_v0  ;;  %256 = vmatprep.mubr.msk.bf16.mxu0 %vm307_vm0, %v306_v1  ;;  %v28_v3 = vld [vmem:[%s397_s0] sm:$0xff]  ;;  %v29_v4 = vld [vmem:[%s397_s0 + $0x8] sm:$0xff] }
   0x3   :  { %254 = vmatprep.subr.bf16.mxu0 %v306_v1  ;;  %262 = vmatprep.mubr.msk.bf16.mxu1 %vm307_vm0, %v306_v1 }
   0x4   :  { %12 = vsyncpa [#allocation3], 0  ;;  %v30_v5 = vpack.c.bf16 %v29_v4, %v28_v3  ;;  %vm54_vm1 = vcmask 261120   ;;  %v273_v6 = vld [vmem:[%s400_s3] sm:$0xff]   ;;  %vm126_vm2 = vcmask 130048   ;;  %s308_s14 = smov [#allocation2]  }
   0x5   :  { %261 = vmatpush3.bf16.msra.mxu1 %v273_v6  ;;  %v238_v7 = vld [vmem:[%s399_s2] ss:$0 sm:$0xff]  ;;  %s227_s15 = sshll.u32 %s308_s14, 4  ;;  %s228_s15 = int_to_ptr.vmem [resolvable:$true] %s227_s15 }
   0x6   :  { %255 = vmatpush3.bf16.msra.mxu0 %v272_v2  ;;  %v242_v25 = vld [vmem:[%s401_s4] ss:$0 sm:$0xff]  ;;  %p287_p1 = scmp.lt.s32.totalorder %s228_s15, %s228_s15 }
   0x7   :  { %v245_v54 = vld [vmem:[%s402_s5] ss:$0 sm:$0xff]  ;;  %s282_s5 = scalar_lea.vmem %s228_s15, 256 }
   0x8   :  { %v246_v56 = vld [vmem:[%s403_s6] ss:$0 sm:$0xff]  ;;  %p283_p0 = scmp.ne.s32.totalorder %s228_s15, %s282_s5  ;;  %p288_p2 = scmp.lt.s32.totalorder %s282_s5, %s282_s5 }
   0x9   :  { %257 = vmatmul.mubr.msk.bf16.vlgmr.msra.gmra.mrb[0].mxu0 %vm54_vm1, %v30_v5 }
   0xa   :  { %p289_p3 = por %p288_p2, %p287_p1 }
   0xc   :  { %p290_p4 = pnand %p289_p3, %p283_p0 }
  0xdc   :  { %v92_v8 = vpop.f32.mrb[0].mxu0 }
  0xdd   :  { %v93_v9 = vadd.f32 %v238_v7, %v92_v8  ;;  %v258_v10 = vpop.f32.mrb[1].mxu0 }
  0xde   :  { %v95_v11 = vpop.f32.mrb[2].mxu0 }
  0xdf   :  { %v102_v12 = vmul.f32 0.70710677, %v93_v9  ;;  %v96_v13 = vadd.f32 %v238_v7, %v95_v11  ;;  %v259_v14 = vpop.f32.mrb[3].mxu0  ;;  %v99_v19 = vmul.f32 0.5, %v93_v9 }
  0xe1   :  { %274 = verf.f32 %v102_v12  ;;  %v103_v15 = vmul.f32 0.70710677, %v96_v13  ;;  %v100_v20 = vmul.f32 0.5, %v96_v13 }
  0xe3   :  { %276 = verf.f32 %v103_v15 }
  0xeb   :  { %v275_v16 = vpop.eup %274 }
  0xec   :  { %v106_v17 = vadd.f32 1.0, %v275_v16 }
  0xed   :  { %v277_v18 = vpop.eup %276 }
  0xee   :  { %v107_v21 = vadd.f32 1.0, %v277_v18  ;;  %v108_v22 = vmul.f32 %v106_v17, %v99_v19 }
  0xf0   :  { %v109_v23 = vmul.f32 %v107_v21, %v100_v20 }
  0xf2   :  { %v110_v24 = vpack.c.bf16 %v109_v23, %v108_v22 }
  0xf4   :  { %263 = vmatmul.mubr.msk.bf16.vlgmr.msra.gmra.mrb[0].mxu1 %vm126_vm2, %v110_v24 }
 0x1c7   :  { %v164_v26 = vpop.f32.mrb[0].mxu1 }
 0x1c8   :  { %v165_v27 = vadd.f32 %v242_v25, %v164_v26  ;;  %v264_v28 = vpop.f32.mrb[1].mxu1 }
 0x1c9   :  { %v167_v29 = vpop.f32.mrb[2].mxu1 }
 0x1ca   :  { %v168_v30 = vadd.f32 %v242_v25, %v167_v29  ;;  %v265_v31 = vpop.f32.mrb[3].mxu1  ;;  %v171_v32 = vsel %vm54_vm1, %v165_v27, 0.0  ;;  %v180_v33 = vmul.f32 %v165_v27, %v165_v27 }
 0x1cb   :  { %172 = vadd.xlane.f32.xlu0 %v171_v32 }
 0x1cc   :  { %v182_v34 = vsel %vm54_vm1, %v180_v33, 0.0  ;;  %v181_v35 = vmul.f32 %v168_v30, %v168_v30  ;;  %v174_v36 = vsel %vm54_vm1, %v168_v30, 0.0 }
 0x1cd   :  { %183 = vadd.xlane.f32.xlu1 %v182_v34 }
 0x1ce   :  { %v185_v37 = vsel %vm54_vm1, %v181_v35, 0.0 }
 0x1cf   :  { %175 = vadd.xlane.f32.xlu0 %v174_v36 }
 0x1d1   :  { %186 = vadd.xlane.f32.xlu1 %v185_v37 }
 0x258   :  { %v173_v38 = vpop.xlane.xlu0 %172 }
 0x259   :  { %v178_v39 = vmul.f32 0.03125, %v173_v38 }
 0x25a   :  { %v184_v40 = vpop.xlane.xlu1 %183 }
 0x25b   :  { %v190_v41 = vmul.f32 %v178_v39, %v178_v39  ;;  %v188_v42 = vmul.f32 0.03125, %v184_v40  ;;  %v194_v52 = vsub.f32 %v165_v27, %v178_v39 }
 0x25c   :  { %v176_v43 = vpop.xlane.xlu0 %175 }
 0x25d   :  { %v192_v44 = vsub.f32 %v188_v42, %v190_v41  ;;  %v179_v45 = vmul.f32 0.03125, %v176_v43 }
 0x25e   :  { %v187_v46 = vpop.xlane.xlu1 %186 }
 0x25f   :  { %v196_v47 = vadd.f32 1e-05, %v192_v44  ;;  %v191_v48 = vmul.f32 %v179_v45, %v179_v45  ;;  %v189_v49 = vmul.f32 0.03125, %v187_v46  ;;  %v195_v57 = vsub.f32 %v168_v30, %v179_v45 }
 0x261   :  { %278 = vrsqrt.f32 %v196_v47  ;;  %v193_v50 = vsub.f32 %v189_v49, %v191_v48 }
 0x263   :  { %v197_v51 = vadd.f32 1e-05, %v193_v50 }
 0x265   :  { %280 = vrsqrt.f32 %v197_v51 }
 0x26b   :  { %v279_v53 = vpop.eup %278 }
 0x26c   :  { %v200_v55 = vmul.f32 %v279_v53, %v194_v52 }
 0x26e   :  { %v209_v58 = vmul.f32 %v245_v54, %v200_v55 }
 0x26f   :  { %v281_v59 = vpop.eup %280 }
 0x270   :  { %v201_v60 = vmul.f32 %v281_v59, %v195_v57  ;;  %v218_v61 = vadd.f32 %v246_v56, %v209_v58 }
 0x272   :  { %v210_v62 = vmul.f32 %v245_v54, %v201_v60  ;;  %220 = vst.msk [vmem:[#allocation2] sm:$0xff] %vm54_vm1, %v218_v61 }
 0x274   :  { %v219_v63 = vadd.f32 %v246_v56, %v210_v62 }
 0x276   :  { %221 = vst.msk [vmem:[#allocation2 + $0x8] sm:$0xff] %vm54_vm1, %v219_v63 }
 0x277   :  { %293 = shalt.err (!%p290_p4)
}
 0x278   :  { %s294_s17 = scalar_lea.hbm %s404_s7, 256 }
 0x279   :  { %p295_p5 = scmp.ne.s32.totalorder %s404_s7, %s294_s17  ;;  %p298_p6 = scmp.lt.u32.totalorder %s294_s17, %s404_s7 }
 0x27b   :  { %p300_p7 = pnand %p298_p6, %p295_p5 }
 0x27d   :  { %303 = shalt.err (!%p300_p7)
}
 0x27e   :  { %s309_s22 = smov 128   ;;  %s310_s23 = smov 8  }
 0x27f   :  { %233 = dma.vmem_to_hbm [thread:$0]  %s228_s15, 256, %s404_s7, [#allocation3], %s309_s22, %s309_s22, %s310_s23  }
 0x280   :  { %304 = dma.done.wait [#allocation3], 256  }
 0x281   :  { %305 = vsyncadd [#allocation3], 4294967040 }
 0x282   :  { %237 = vsyncpa [#allocation3], 1 }

</bundles_post_ra>
